<compile_context>
chip_gen: v7x
topology: tpu7x:2x2x1
jax: 0.10.0
libtpu: 0.0.40
codegen_flags: <defaults>
</compile_context>

<pallas_src>
import math

import jax
import jax.numpy as jnp
from jax.experimental import pallas as pl
from jax.experimental.pallas import tpu as pltpu


def _flatten_dma_kernel(x_hbm, o_hbm, sem):
    # Single whole-array DMA: HBM source -> HBM destination.  No grid, no
    # VMEM staging, no vector load/store traffic — just the DMA engine.
    cp = pltpu.make_async_copy(x_hbm, o_hbm, sem)
    cp.start()
    cp.wait()


def _materialize_copy(x2d: jax.Array) -> jax.Array:
    """Materialize an already-flattened (n, flat) array into a fresh buffer."""
    n, flat = x2d.shape
    itemsize = jnp.dtype(x2d.dtype).itemsize
    return pl.pallas_call(
        _flatten_dma_kernel,
        out_shape=jax.ShapeDtypeStruct((n, flat), x2d.dtype),
        # Raw HBM refs on both sides; the kernel body drives the copy itself.
        in_specs=[pl.BlockSpec(memory_space=pl.ANY)],
        out_specs=pl.BlockSpec(memory_space=pl.ANY),
        scratch_shapes=[pltpu.SemaphoreType.DMA(())],
        # Pure-bandwidth op: read + write every byte once.
        cost_estimate=pl.CostEstimate(
            flops=0,
            transcendentals=0,
            bytes_accessed=2 * n * flat * itemsize,
        ),
    )(x2d)


def flatten(x: jax.Array, *, materialize: bool = False) -> jax.Array:
    """Pallas equivalent of torch `x.view(x.size(0), -1)` (any rank >= 1).

    By default this is a free metadata reshape (exactly what `.view` is for a
    contiguous tensor).  Pass `materialize=True` to force a fresh HBM buffer
    produced by a single whole-array DMA inside a Pallas kernel.
    """
    n = x.shape[0]
    flat = int(math.prod(x.shape[1:])) if x.ndim > 1 else 1

    # Contiguous reshape: metadata only, no data movement.
    x2d = x.reshape(n, flat)
    if not materialize:
        return x2d
    return _materialize_copy(x2d)


if __name__ == "__main__":
    key = jax.random.PRNGKey(0)
    # Small NCHW input consistent with a conv-net flatten: (2, 4, 16, 16)
    x = jax.random.normal(key, (2, 4, 16, 16), dtype=jnp.float32)

    # Reference: same semantics as torch .view(x.size(0), -1) (C-order).
    ref = x.reshape(x.shape[0], -1)

    # Default (metadata-only) path.
    out_view = jax.block_until_ready(flatten(x))
    assert out_view.shape == (2, 4 * 16 * 16), out_view.shape
    assert out_view.dtype == x.dtype
    assert bool(jnp.array_equal(out_view, ref))

    # Materialized path: exercises the Pallas DMA kernel.
    out_copy = jax.block_until_ready(flatten(x, materialize=True))
    assert out_copy.shape == (2, 4 * 16 * 16), out_copy.shape
    assert out_copy.dtype == x.dtype
    assert bool(jnp.array_equal(out_copy, ref))

    print("KERNEL_OK")
</pallas_src>

<mosaic_0001>
module attributes {stable_mosaic.version = 11 : i64} {
  func.func @_flatten_dma_kernel(%arg0: memref<2x1024xf32, #tpu.memory_space<any>>, %arg1: memref<2x1024xf32, #tpu.memory_space<any>>, %arg2: memref<!tpu.dma_semaphore, #tpu.memory_space<semaphore_mem>>) attributes {dimension_semantics = [], scalar_prefetch = 0 : i64, scratch_operands = 1 : i64, tpu.core_type = #tpu.core_type<tc>} {
    tpu.enqueue_dma source(%arg0 : memref<2x1024xf32, #tpu.memory_space<any>>) target(%arg1 : memref<2x1024xf32, #tpu.memory_space<any>>) target_semaphore(%arg2 : memref<!tpu.dma_semaphore, #tpu.memory_space<semaphore_mem>>)
    tpu.wait_dma2 semaphore(%arg2 : memref<!tpu.dma_semaphore, #tpu.memory_space<semaphore_mem>>) src(%arg0 : memref<2x1024xf32, #tpu.memory_space<any>>) dst(%arg1 : memref<2x1024xf32, #tpu.memory_space<any>>)
    return
  }
}

</mosaic_0001>

<bundles_post_ra>
// kernel: tpu_custom_call.1
= control target key start
LH: loop header
LB: loop body
LE: loop exit
PB: predicated region body
PF: predicated region fallthrough
CT: control target
= control target key end

     0   :  { %s35_s6 = smov [#allocation2]   ;;  %s36_s7 = smov [#allocation3]   ;;  %s54_s0 = inlined_call_operand.hbm [shape: f32[2,1024], index: 0, kind: input, shape index: {}]   ;;  %s55_s1 = inlined_call_operand.hbm [shape: f32[2,1024], index: 1, kind: output, shape index: {}]  }
   0x1   :  { %s37_s8 = smov 0  }
   0x2   :  { %18 = dma.general %s54_s0, 256, %s55_s1, %s35_s6, %s36_s7, [#allocation4], %s37_s8, 0  }
   0x3   :  { %33 = dma.done.wait [#allocation2], 256 }
   0x4   :  { %34 = vsyncadd [#allocation2], 4294967040 }
   0x5   :  { %23 = vsyncmov [#allocation2] }
   0x8   :  { %s24_s13 = vpop.sfrf %23 }
   0x9   :  { %p29_p0 = scmp.ne.s32.totalorder %s24_s13, 0 }
   0xb   :  { %28 = shalt.err (%p29_p0)  }

</bundles_post_ra>
